<compile_context>
chip_gen: v5e
topology: v5e:2x2
jax: 0.10.0
libtpu: 0.0.40
codegen_flags: <defaults>
</compile_context>

<pallas_src>
import functools

import jax
import jax.numpy as jnp
from jax.experimental import pallas as pl
from jax.experimental.pallas import tpu as pltpu


# 19-compare median-of-9 selection network (Devillard / Paeth). CE(a,b) leaves
# min in slot a, max in slot b; the median ends up in slot 4.
_MED9_NET = (
    (1, 2), (4, 5), (7, 8), (0, 1), (3, 4), (6, 7), (1, 2), (4, 5), (7, 8),
    (0, 3), (5, 8), (4, 7), (3, 6), (1, 4), (2, 5), (4, 7), (4, 2), (6, 4),
    (4, 2),
)


def _ce(vals, i, j):
    a, b = vals[i], vals[j]
    vals[i] = jnp.minimum(a, b)
    vals[j] = jnp.maximum(a, b)


def _median9(window):
    p = [window(i) for i in range(9)]
    for a, b in _MED9_NET:
        _ce(p, a, b)
    return p[4]


def _forgetful_median(window, n):
    """Median of n (odd) lazily produced planes; <= n//2 + 2 live at a time."""
    r = n // 2 + 2
    buf = [window(i) for i in range(r)]
    # Full sort of the initial buffer (odd-even transposition network).
    for ph in range(r):
        for i in range(ph % 2, r - 1, 2):
            _ce(buf, i, i + 1)
    buf = buf[1:-1]                              # min/max cannot be the median
    for idx in range(r, n):
        buf.append(window(idx))
        for i in range(len(buf) - 1, 0, -1):     # insertion chain keeps buf sorted
            _ce(buf, i - 1, i)
        buf = buf[1:-1]
    return buf[0]                                # single survivor == median


def _sorted_lower_median(window, n):
    """Fallback (even k): full sort, take the lower median (torch.median)."""
    vals = [window(i) for i in range(n)]
    for ph in range(n):
        for i in range(ph % 2, n - 1, 2):
            _ce(vals, i, i + 1)
    return vals[(n - 1) // 2]


def _median_blur_kernel(x_ref, o_ref, pad_ref, *, ksize, pad, H, W, Ho, Wo):
    """x_ref: (1, Cblk, H, W) unpadded; o_ref: (1, Cblk, Ho, Wo);
    pad_ref: (Cblk, Hp, Wp) VMEM scratch for in-kernel zero padding."""
    k = ksize
    if pad > 0:
        # In-kernel zero padding (VMEM scratch) -> no jnp.pad HBM pass upstream.
        pad_ref[...] = jnp.zeros(pad_ref.shape, pad_ref.dtype)
        pad_ref[:, pad:pad + H, pad:pad + W] = x_ref[0]
        xp = pad_ref[...]                        # (Cblk, Hp, Wp) value in vregs
    else:
        xp = x_ref[0]                            # no padding needed

    def window(idx):
        di, dj = divmod(idx, k)
        return xp[:, di:di + Ho, dj:dj + Wo]

    n = k * k
    if k == 3:
        med = _median9(window)
    elif n % 2 == 1:
        med = _forgetful_median(window, n)
    else:
        med = _sorted_lower_median(window, n)
    o_ref[0] = med


def _num_compare_exchanges(k):
    n = k * k
    if n <= 1:
        return 0
    if k == 3:
        return len(_MED9_NET)
    if n % 2 == 1:
        r = n // 2 + 2
        ces = r * (r - 1) // 2
        size = r - 2
        for _ in range(n - r):
            size += 1
            ces += size - 1
            size -= 2
        return ces
    return n * (n - 1) // 2


def _pick_channel_block(B, C, Hp, Wp, itemsize, k):
    """Largest channel block whose working set stays well inside VMEM."""
    n = k * k
    # live window planes + padded scratch + double-buffered in/out blocks.
    live = (9 if k == 3 else min(n, n // 2 + 2)) + 6
    per_chan = live * Hp * Wp * max(itemsize, 4)
    budget = 8 * 1024 * 1024                           # safe on v5e/v6e/v7x
    cblk = max(1, min(C, budget // max(per_chan, 1)))
    while C % cblk != 0:                               # avoid ragged channel tails
        cblk -= 1
    if B == 1 and C // cblk < 2 and C > 1:
        cblk = max(1, C // 2)                          # >=2 grid steps for 2 TCs
        while C % cblk != 0:
            cblk -= 1
    return cblk


def median_blur(x, kernel_size):
    """Median blur of an NCHW tensor with zero padding (kornia median_blur)."""
    k = int(kernel_size)
    B, C, H, W = x.shape
    if k <= 1:
        return x
    pad = (k - 1) // 2
    Hp, Wp = H + 2 * pad, W + 2 * pad
    Ho, Wo = Hp - k + 1, Wp - k + 1                    # == H, W for odd k

    itemsize = jnp.dtype(x.dtype).itemsize
    cblk = _pick_channel_block(B, C, Hp, Wp, itemsize, k)

    kernel = functools.partial(_median_blur_kernel, ksize=k, pad=pad,
                               H=H, W=W, Ho=Ho, Wo=Wo)
    cost = pl.CostEstimate(
        flops=2 * B * C * Ho * Wo * _num_compare_exchanges(k),
        transcendentals=0,
        bytes_accessed=(B * C * H * W + B * C * Ho * Wo) * itemsize)

    return pl.pallas_call(
        kernel,
        out_shape=jax.ShapeDtypeStruct((B, C, Ho, Wo), x.dtype),
        grid=(B, C // cblk),
        in_specs=[pl.BlockSpec((1, cblk, H, W), lambda b, c: (b, c, 0, 0))],
        out_specs=pl.BlockSpec((1, cblk, Ho, Wo), lambda b, c: (b, c, 0, 0)),
        scratch_shapes=[pltpu.VMEM((cblk, Hp, Wp), x.dtype)],
        compiler_params=pltpu.CompilerParams(
            dimension_semantics=("parallel", "parallel")),
        cost_estimate=cost,
    )(x)


class MedianFilter:
    """JAX/Pallas port of noise_layers.Median_filter.Median_filter."""

    def __init__(self, kernel_size):
        self.kernel_size = int(kernel_size)

    def __call__(self, noised_and_cover):
        encoded = noised_and_cover[0]
        noised_and_cover[0] = median_blur(encoded, self.kernel_size)
        return noised_and_cover


def _reference_median_blur(x, k):
    """Pure-JAX reference for correctness checking."""
    pad = (k - 1) // 2
    xp = jnp.pad(x, ((0, 0), (0, 0), (pad, pad), (pad, pad)))
    B, C, Hp, Wp = xp.shape
    Ho, Wo = Hp - k + 1, Wp - k + 1
    windows = jnp.stack(
        [xp[:, :, di:di + Ho, dj:dj + Wo] for di in range(k) for dj in range(k)],
        axis=2)                                 # (B, C, k*k, Ho, Wo)
    srt = jnp.sort(windows, axis=2)
    return srt[:, :, (k * k - 1) // 2]          # lower median (torch.median)


if __name__ == "__main__":
    key = jax.random.PRNGKey(0)
    x = jax.random.normal(key, (2, 4, 16, 16), dtype=jnp.float32)

    # k=3: median-of-9 selection network path (the common case).
    layer = MedianFilter(kernel_size=3)
    noised_and_cover = [x, x]  # [encoded, cover]
    out3 = layer(noised_and_cover)[0]
    out3 = jax.block_until_ready(out3)
    ref3 = _reference_median_blur(x, 3)
    assert out3.shape == ref3.shape == (2, 4, 16, 16)
    assert jnp.allclose(out3, ref3, atol=1e-6), "median blur (k=3) mismatch"

    # k=5: forgetful-selection path.
    out5 = jax.block_until_ready(median_blur(x, 5))
    ref5 = _reference_median_blur(x, 5)
    assert out5.shape == ref5.shape == (2, 4, 16, 16)
    assert jnp.allclose(out5, ref5, atol=1e-6), "median blur (k=5) mismatch"

    print("KERNEL_OK")
</pallas_src>

<mosaic_0001>
module attributes {stable_mosaic.version = 11 : i64} {
  func.func @_median_blur_kernel(%arg0: i32, %arg1: i32, %arg2: memref<1x4x16x16xf32, #tpu.memory_space<vmem>>, %arg3: memref<1x4x16x16xf32, #tpu.memory_space<vmem>>, %arg4: memref<4x18x18xf32, #tpu.memory_space<vmem>>) attributes {dimension_semantics = [#tpu.dimension_semantics<parallel>, #tpu.dimension_semantics<parallel>], iteration_bounds = array<i64: 2, 1>, scalar_prefetch = 0 : i64, scratch_operands = 1 : i64, tpu.core_type = #tpu.core_type<tc>, window_params = [{transform_indices = @transform_0, window_bounds = array<i64: 1, 4, 16, 16>}, {transform_indices = @transform_1, window_bounds = array<i64: 1, 4, 16, 16>}]} {
    %cst = arith.constant 0.000000e+00 : f32
    %0 = vector.broadcast %cst : f32 to vector<4x18x18xf32>
    %c0 = arith.constant 0 : index
    %c0_0 = arith.constant 0 : index
    %c0_1 = arith.constant 0 : index
    %1 = vector.load %arg4[%c0, %c0_0, %c0_1] : memref<4x18x18xf32, #tpu.memory_space<vmem>>, vector<4x18x18xf32>
    tpu.vector_store %arg4[%c0, %c0_0, %c0_1], %0 {strides = array<i32>} : memref<4x18x18xf32, #tpu.memory_space<vmem>>, vector<4x18x18xf32>,
    %c0_2 = arith.constant 0 : index
    %c0_3 = arith.constant 0 : index
    %c0_4 = arith.constant 0 : index
    %c0_5 = arith.constant 0 : index
    %2 = vector.load %arg2[%c0_2, %c0_3, %c0_4, %c0_5] : memref<1x4x16x16xf32, #tpu.memory_space<vmem>>, vector<1x4x16x16xf32>
    %3 = vector.shape_cast %2 : vector<1x4x16x16xf32> to vector<4x16x16xf32>
    %c0_6 = arith.constant 0 : index
    %c1 = arith.constant 1 : index
    %c1_7 = arith.constant 1 : index
    %4 = vector.load %arg4[%c0_6, %c1, %c1_7] : memref<4x18x18xf32, #tpu.memory_space<vmem>>, vector<4x16x16xf32>
    tpu.vector_store %arg4[%c0_6, %c1, %c1_7], %3 {strides = array<i32>} : memref<4x18x18xf32, #tpu.memory_space<vmem>>, vector<4x16x16xf32>,
    %c0_8 = arith.constant 0 : index
    %c0_9 = arith.constant 0 : index
    %c0_10 = arith.constant 0 : index
    %5 = vector.load %arg4[%c0_8, %c0_9, %c0_10] : memref<4x18x18xf32, #tpu.memory_space<vmem>>, vector<4x18x18xf32>
    %6 = vector.extract_strided_slice %5 {offsets = [0, 0, 0], sizes = [4, 16, 16], strides = [1, 1, 1]} : vector<4x18x18xf32> to vector<4x16x16xf32>
    %7 = vector.extract_strided_slice %5 {offsets = [0, 0, 1], sizes = [4, 16, 16], strides = [1, 1, 1]} : vector<4x18x18xf32> to vector<4x16x16xf32>
    %8 = vector.extract_strided_slice %5 {offsets = [0, 0, 2], sizes = [4, 16, 16], strides = [1, 1, 1]} : vector<4x18x18xf32> to vector<4x16x16xf32>
    %9 = vector.extract_strided_slice %5 {offsets = [0, 1, 0], sizes = [4, 16, 16], strides = [1, 1, 1]} : vector<4x18x18xf32> to vector<4x16x16xf32>
    %10 = vector.extract_strided_slice %5 {offsets = [0, 1, 1], sizes = [4, 16, 16], strides = [1, 1, 1]} : vector<4x18x18xf32> to vector<4x16x16xf32>
    %11 = vector.extract_strided_slice %5 {offsets = [0, 1, 2], sizes = [4, 16, 16], strides = [1, 1, 1]} : vector<4x18x18xf32> to vector<4x16x16xf32>
    %12 = vector.extract_strided_slice %5 {offsets = [0, 2, 0], sizes = [4, 16, 16], strides = [1, 1, 1]} : vector<4x18x18xf32> to vector<4x16x16xf32>
    %13 = vector.extract_strided_slice %5 {offsets = [0, 2, 1], sizes = [4, 16, 16], strides = [1, 1, 1]} : vector<4x18x18xf32> to vector<4x16x16xf32>
    %14 = vector.extract_strided_slice %5 {offsets = [0, 2, 2], sizes = [4, 16, 16], strides = [1, 1, 1]} : vector<4x18x18xf32> to vector<4x16x16xf32>
    %15 = arith.minimumf %7, %8 : vector<4x16x16xf32>
    %16 = arith.maximumf %7, %8 : vector<4x16x16xf32>
    %17 = arith.minimumf %10, %11 : vector<4x16x16xf32>
    %18 = arith.maximumf %10, %11 : vector<4x16x16xf32>
    %19 = arith.minimumf %13, %14 : vector<4x16x16xf32>
    %20 = arith.maximumf %13, %14 : vector<4x16x16xf32>
    %21 = arith.minimumf %6, %15 : vector<4x16x16xf32>
    %22 = arith.maximumf %6, %15 : vector<4x16x16xf32>
    %23 = arith.minimumf %9, %17 : vector<4x16x16xf32>
    %24 = arith.maximumf %9, %17 : vector<4x16x16xf32>
    %25 = arith.minimumf %12, %19 : vector<4x16x16xf32>
    %26 = arith.maximumf %12, %19 : vector<4x16x16xf32>
    %27 = arith.minimumf %22, %16 : vector<4x16x16xf32>
    %28 = arith.maximumf %22, %16 : vector<4x16x16xf32>
    %29 = arith.minimumf %24, %18 : vector<4x16x16xf32>
    %30 = arith.maximumf %24, %18 : vector<4x16x16xf32>
    %31 = arith.minimumf %26, %20 : vector<4x16x16xf32>
    %32 = arith.maximumf %26, %20 : vector<4x16x16xf32>
    %33 = arith.maximumf %21, %23 : vector<4x16x16xf32>
    %34 = arith.minimumf %30, %32 : vector<4x16x16xf32>
    %35 = arith.minimumf %29, %31 : vector<4x16x16xf32>
    %36 = arith.maximumf %29, %31 : vector<4x16x16xf32>
    %37 = arith.maximumf %33, %25 : vector<4x16x16xf32>
    %38 = arith.maximumf %27, %35 : vector<4x16x16xf32>
    %39 = arith.minimumf %28, %34 : vector<4x16x16xf32>
    %40 = arith.minimumf %38, %36 : vector<4x16x16xf32>
    %41 = arith.minimumf %40, %39 : vector<4x16x16xf32>
    %42 = arith.maximumf %40, %39 : vector<4x16x16xf32>
    %43 = arith.maximumf %37, %41 : vector<4x16x16xf32>
    %44 = arith.minimumf %43, %42 : vector<4x16x16xf32>
    %c0_11 = arith.constant 0 : index
    %c0_12 = arith.constant 0 : index
    %c0_13 = arith.constant 0 : index
    %c0_14 = arith.constant 0 : index
    %45 = vector.load %arg3[%c0_11, %c0_12, %c0_13, %c0_14] : memref<1x4x16x16xf32, #tpu.memory_space<vmem>>, vector<1x4x16x16xf32>
    %46 = vector.shape_cast %45 : vector<1x4x16x16xf32> to vector<4x16x16xf32>
    %47 = vector.shape_cast %44 : vector<4x16x16xf32> to vector<1x4x16x16xf32>
    tpu.vector_store %arg3[%c0_11, %c0_12, %c0_13, %c0_14], %47 {strides = array<i32>} : memref<1x4x16x16xf32, #tpu.memory_space<vmem>>, vector<1x4x16x16xf32>,
    return
  }
  func.func @transform_0(%arg0: i32, %arg1: i32) -> (i32, i32, i32, i32) {
    %c0_i32 = arith.constant 0 : i32
    %c0_i32_0 = arith.constant 0 : i32
    %c0_i32_1 = arith.constant 0 : i32
    return %arg0, %arg1, %c0_i32, %c0_i32_0 : i32, i32, i32, i32
  }
  func.func @transform_1(%arg0: i32, %arg1: i32) -> (i32, i32, i32, i32) {
    %c0_i32 = arith.constant 0 : i32
    %c0_i32_0 = arith.constant 0 : i32
    %c0_i32_1 = arith.constant 0 : i32
    return %arg0, %arg1, %c0_i32, %c0_i32_0 : i32, i32, i32, i32
  }
}

</mosaic_0001>

<bundles_post_ra>
// kernel: tpu_custom_call.1
= control target key start
LH: loop header
LB: loop body
LE: loop exit
PB: predicated region body
PF: predicated region fallthrough
CT: control target
= control target key end

     0   :  { %6 = vsyncpa [#allocation4], 0  ;;  %s1745_s0 = inlined_call_operand.hbm [shape: f32[2,4,16,16], index: 0, kind: input, shape index: {}]   ;;  %s1746_s1 = inlined_call_operand.hbm [shape: f32[2,4,16,16], index: 1, kind: output, shape index: {}]  }
   0x1   :  { %8 = vsyncpa [#allocation4 + $0x1], 0 }
   0x2   :  { %9 = vsyncpa [#allocation5], 0 }
   0x3   :  { %11 = vsyncpa [#allocation5 + $0x1], 0  ;;  %s1167_s6 = smov 0   ;;  %s1169_s7 = smov 0  }
   0x4   :  { %s1171_s8 = smov 0   ;;  %s1173_s9 = smov 0  }
   0x5   :  { %s1175_s10 = smov 0   ;;  %s1177_s11 = smov 0  }
   0x6 LB: > { %s950_s12 = sadd.s32 4294967295, %s1148_s11   ;;  %s951_s13 = sadd.s32 4294967294, %s1148_s11   ;;  %s1148_s11 = sphi %s1177_s11, %s17_s11   ;;  %s1144_s10 = sphi %s1175_s10, %s1755_s10   ;;  %s1140_s9 = sphi %s1173_s9, %s1754_s9   ;;  %s1136_s8 = sphi %s1171_s8, %s1753_s8   ;;  %s1132_s7 = sphi %s1169_s7, %s1752_s7   ;;  %s1128_s6 = sphi %s1167_s6, %s1751_s6  }
   0x7   : > { %s29_s14 = sadd.s32 1, %s1144_s10  ;;  %s38_s15 = sadd.s32 1, %s1136_s8 }
   0x8   : > { %p31_p0 = scmp.ge.s32.totalorder %s29_s14, 2  ;;  %p45_p1 = scmp.ne.s32.totalorder %s1136_s8, %s1132_s7 }
   0x9   : > { %p46_p2 = scmp.eq.s32.totalorder %s1148_s11, 0  ;;  %p51_p3 = scmp.ne.s32.totalorder %s1132_s7, %s1128_s6 }
   0xa   : > { %s1757_s14 = smov (%p31_p0, %s29_s14), 0  ;;  %p52_p5 = scmp.eq.s32.totalorder %s950_s12, 0 }
   0xb   : > { %p1208_p4 = por %p46_p2, %p45_p1  ;;  %s33_s17 = ssub.s32 %s1144_s10, %s1757_s14 }
   0xc   : > { %p77_p6 = scmp.eq.s32.totalorder %s950_s12, 1  ;;  %p36_p7 = scmp.eq.s32.totalorder %s33_s17, 0 }
   0xd   : > { %p1214_p8 = por %p52_p5, %p51_p3  ;;  %p83_p10 = scmp.eq.s32.totalorder %s951_s13, 1 }
   0xe   : > { %p1218_p9 = por %p77_p6, %p45_p1  ;;  %p953_p12 = scmp.ge.s32.totalorder %s1148_s11, 2 }
   0xf   : > { %s1223_s20 = scalar_select %p36_p7, %s1136_s8, %s38_s15  }
  0x10   : > { %p1225_p11 = por %p83_p10, %p51_p3  ;;  %p979_p13 = scmp.lt.s32.totalorder %s1148_s11, 2 }
  0x11   : > { %s103_s22 = sand.u32 1, %s1136_s8   ;;  %s965_s24 = sshll.u32 %s1144_s10, 6 }
  0x12   : > { %s954_s23 = sshll.u32 %s103_s22, 6  ;;  %s115_s27 = scalar_lea.hbm %s1745_s0, %s965_s24 }
  0x13   : > { %s107_s28 = scalar_lea.vmem [#allocation3], %s954_s23  ;;  %s116_s30 = sshll.u32 %s115_s27, 4  ;;  %s117_s30 = int_to_ptr.hbm [resolvable:$true] %s116_s30 }
  0x14   : > { %s118_s29 = sshll.u32 %s107_s28, 4  ;;  %p972_p0 = pnand %p979_p13, %p1208_p4  ;;  %s119_s29 = int_to_ptr.vmem [resolvable:$true] %s118_s29 }
  0x15   : > { %p957_p1 = scmp.ge.s32.totalorder %s1148_s11, 1  ;;  %s104_s2 = scalar_lea.sflag [#allocation4], %s103_s22 }
  0x16   : > { %s1150_s3 = smov 128   ;;  %s1151_s4 = smov 8  }
  0x17   : > { %974 = dma.hbm_to_vmem [thread:$0]  (!%p972_p0), %s117_s30, 1024, %s119_s29, %s104_s2, %s1150_s3, %s1150_s3, %s1151_s4  }
  0x18   : > { %p126_p2 = scmp.lt.s32.totalorder %s1148_s11, 3 }
  0x1a   : > { %p127_p3 = pnand %p957_p1, %p126_p2 }
  0x1b   : > { %s1241_s5 = sand.u32 (!%p127_p3), 1, %s1132_s7  }
  0x1c   : > { %130 = sbr.rel (%p127_p3) target bundleno = 486 (0x1e6), region = 24  ;;  %s958_s12 = sshll.u32 (!%p127_p3), %s1241_s5, 6 }
  0x1d   : > { %s133_s13 = scalar_lea.sflag (!%p127_p3), [#allocation4], %s1241_s5  ;;  %s136_s15 = scalar_lea.vmem (!%p127_p3), [#allocation3], %s958_s12 }
  0x21   : > { %1119 = dma.done.wait (%p1214_p8), %s133_s13, 1024  }
  0x22   : > { %1121 = vsyncadd (%p1214_p8), %s133_s13, 4294966272  ;;  %vm158_vm0 = vcmask 146432   ;;  %v1152_v0 = vmov 0.0   ;;  %v174_v1 = vld [vmem:[%s136_s15 + $0x10] sm:$0xff]  ;;  %v172_v2 = vld [vmem:[%s136_s15] sm:$0xff]  ;;  %s1153_s16 = smov 1  }
  0x23   : > { %166 = vst.msk [vmem:[#allocation2 + $0x30] sm:$0xff] %vm158_vm0, %v1152_v0  ;;  %192 = vrot.lane.b32.xlu1 %v174_v1, %s1153_s16  ;;  %188 = vrot.lane.b32.xlu0 %v172_v2, %s1153_s16  ;;  %v176_v3 = vld [vmem:[%s136_s15 + $0x20] sm:$0xff]  ;;  %v175_v4 = vld [vmem:[%s136_s15 + $0x18] sm:$0xff]  ;;  %vm161_vm1 = vcmask 140288   ;;  %vm212_vm2 = vcmask 138248   ;;  %s1154_s17 = smov 127  }
  0x24   : > { %167 = vst.msk [vmem:[#allocation2 + $0x38] sm:$0xff] %vm158_vm0, %v1152_v0  ;;  %196 = vrot.lane.b32.xlu2 %v176_v3, %s1153_s16  ;;  %v173_v5 = vld [vmem:[%s136_s15 + $0x8] sm:$0xff]  ;;  %v178_v7 = vld [vmem:[%s136_s15 + $0x30] sm:$0xff]  ;;  %v179_v8 = vld [vmem:[%s136_s15 + $0x38] sm:$0xff]  ;;  %vm461_vm3 = vcmask 1046528   ;;  %vm622_vm4 = vcmask 1045504  }
  0x25   : > { %159 = vst.msk [vmem:[#allocation2] sm:$0xff] %vm158_vm0, %v1152_v0  ;;  %v177_v6 = vld [vmem:[%s136_s15 + $0x28] sm:$0xff]  ;;  %vm835_vm5 = vcmask 130048   ;;  %s1467_s18 = scalar_lea.vmem [#allocation6], %s958_s12  ;;  %s966_s22 = sshll.u32 %s1140_s9, 6 }
  0x26   : > { %160 = vst.msk [vmem:[#allocation2 + $0x8] sm:$0xff] %vm158_vm0, %v1152_v0  ;;  %s859_s24 = scalar_lea.hbm %s1746_s1, %s966_s22  ;;  %s860_s25 = sshll.u32 %s1467_s18, 4  ;;  %s861_s25 = int_to_ptr.vmem [resolvable:$true] %s860_s25 }
  0x27   : > { %163 = vst.msk [vmem:[#allocation2 + $0x18] sm:$0xff] %vm158_vm0, %v1152_v0  ;;  %s862_s26 = sshll.u32 %s859_s24, 4  ;;  %s845_s27 = scalar_lea.sflag [#allocation5], %s1241_s5  ;;  %s863_s26 = int_to_ptr.hbm [resolvable:$true] %s862_s26 }
  0x28   : > { %164 = vst.msk [vmem:[#allocation2 + $0x20] sm:$0xff] %vm158_vm0, %v1152_v0  ;;  %s1080_s28 = sshra.s32 %s863_s26, 4  ;;  %s1086_s3 = scalar_lea.hbm %s1746_s1, 128  ;;  %s1081_s28 = int_to_ptr.hbm [resolvable:$true] %s1080_s28 }
  0x29   : > { %169 = vst.msk [vmem:[#allocation2 + $0x48] sm:$0xff] %vm158_vm0, %v1152_v0  ;;  %s1082_s29 = scalar_lea.hbm %s1081_s28, 64  ;;  %p1087_p7 = scmp.lt.s32.totalorder %s1081_s28, %s1746_s1 }
  0x2a   : > { %170 = vst.msk [vmem:[#allocation2 + $0x50] sm:$0xff] %vm158_vm0, %v1152_v0  ;;  %p1083_p4 = scmp.ne.s32.totalorder %s1081_s28, %s1082_s29  ;;  %p1088_p8 = scmp.lt.s32.totalorder %s1086_s3, %s1082_s29 }
  0x2b   : > { %194 = vrot.lane.b32.xlu1 %v175_v4, %s1153_s16  ;;  %190 = vrot.lane.b32.xlu0 %v173_v5, %s1153_s16  ;;  %168 = vst.msk [vmem:[#allocation2 + $0x40] sm:$0x3] %vm161_vm1, %v1152_v0 }
  0x2c   : > { %198 = vrot.lane.b32.xlu2 %v177_v6, %s1153_s16  ;;  %162 = vst.msk [vmem:[#allocation2 + $0x10] sm:$0x3] %vm161_vm1, %v1152_v0  ;;  %p1084_p5 = pnand %p1083_p4, %p1218_p9  ;;  %p1089_p10 = por %p1088_p8, %p1087_p7 }
  0x2d   : > { %165 = vst.msk [vmem:[#allocation2 + $0x28] sm:$0x3] %vm161_vm1, %v1152_v0 }
  0x2e   : > { %171 = vst.msk [vmem:[#allocation2 + $0x58] sm:$0x3] %vm161_vm1, %v1152_v0  ;;  %p1085_p6 = pneg %p1084_p5 }
  0x30   : > { %p1090_p13 = pnand %p1089_p10, %p1085_p6 }
  0x33   : > { %200 = vrot.lane.b32.xlu0 %v178_v7, %s1153_s16  ;;  %202 = vrot.lane.b32.xlu1 %v179_v8, %s1153_s16 }
  0x7e   : > { %v197_v9 = vpop.permute.xlu2 %196 }
  0x7f   : > { %217 = vst.msk [vmem:[#allocation2 + $0x31] sm:$0xff] %vm212_vm2, %v197_v9 }
  0x86   : > { %v199_v10 = vpop.permute.xlu2 %198  ;;  %v1285_v24 = vld [vmem:[#allocation2 + $0x30] sm:$0xff] }
  0x87   : > { %218 = vst.msk [vmem:[#allocation2 + $0x39] sm:$0xff] %vm212_vm2, %v199_v10 }
  0x8e   : > { %v1265_v17 = vld [vmem:[#allocation2 + $0x38] sm:$0xff]  ;;  %v1303_v28 = vld [vmem:[#allocation2 + $0x40] sm:$0x3] }
  0x95   : > { %v193_v11 = vpop.permute.xlu1 %192  ;;  %v189_v12 = vpop.permute.xlu0 %188 }
  0x96   : > { %215 = vst.msk [vmem:[#allocation2 + $0x19] sm:$0xff] %vm212_vm2, %v193_v11 }
  0x97   : > { %213 = vst.msk [vmem:[#allocation2 + $0x1] sm:$0xff] %vm212_vm2, %v189_v12 }
  0x9d   : > { %v195_v13 = vpop.permute.xlu1 %194  ;;  %v191_v14 = vpop.permute.xlu0 %190  ;;  %v1255_v15 = vld [vmem:[#allocation2 + $0x18] sm:$0xff] }
  0x9e   : > { %216 = vst.msk [vmem:[#allocation2 + $0x21] sm:$0xff] %vm212_vm2, %v195_v13  ;;  %245 = vrot.lane.b32.xlu1 %v1255_v15, %s1154_s17  ;;  %v1260_v16 = vld [vmem:[#allocation2] sm:$0xff] }
  0x9f   : > { %214 = vst.msk [vmem:[#allocation2 + $0x9] sm:$0xff] %vm212_vm2, %v191_v14  ;;  %241 = vrot.lane.b32.xlu2 %v1260_v16, %s1154_s17 }
  0xa5   : > { %v201_v18 = vpop.permute.xlu0 %200  ;;  %v1267_v19 = vld [vmem:[#allocation2 + $0x20] sm:$0xff]  ;;  %v203_v20 = vpop.permute.xlu1 %202  ;;  %v1297_v27 = vld [vmem:[#allocation2 + $0x28] sm:$0x3] }
  0xa6   : > { %219 = vst.msk [vmem:[#allocation2 + $0x49] sm:$0xff] %vm212_vm2, %v201_v18  ;;  %251 = vrot.lane.b32.xlu1 %v1265_v17, %s1154_s17  ;;  %v1272_v21 = vld [vmem:[#allocation2 + $0x8] sm:$0xff]  ;;  %v1279_v22 = vld [vmem:[#allocation2 + $0x10] sm:$0x3] }
  0xa7   : > { %243 = vrot.lane.b32.xlu0 %v1272_v21, %s1154_s17  ;;  %247 = vrot.lane.b32.xlu2 %v1267_v19, %s1154_s17  ;;  %220 = vst.msk [vmem:[#allocation2 + $0x51] sm:$0xff] %vm212_vm2, %v203_v20 }
  0xad   : > { %v1281_v23 = vld [vmem:[#allocation2 + $0x48] sm:$0xff] }
  0xae   : > { %285 = vrot.lane.b32.xlu1 %v1279_v22, %s1154_s17  ;;  %v1291_v25 = vld [vmem:[#allocation2 + $0x58] sm:$0x3]  ;;  %v1293_v26 = vld [vmem:[#allocation2 + $0x50] sm:$0xff] }
  0xaf   : > { %249 = vrot.lane.b32.xlu0 %v1285_v24, %s1154_s17  ;;  %253 = vrot.lane.b32.xlu2 %v1281_v23, %s1154_s17 }
  0xb6   : > { %291 = vrot.lane.b32.xlu1 %v1291_v25, %s1154_s17 }
  0xb7   : > { %255 = vrot.lane.b32.xlu0 %v1293_v26, %s1154_s17  ;;  %287 = vrot.lane.b32.xlu2 %v1297_v27, %s1154_s17 }
  0xbf   : > { %289 = vrot.lane.b32.xlu0 %v1303_v28, %s1154_s17 }
  0xf9   : > { %v242_v29 = vpop.permute.xlu2 %241 }
  0xfa   : > { %v265_v30 = vmin.f32 %v1260_v16, %v242_v29  ;;  %v273_v42 = vmax.f32 %v1260_v16, %v242_v29 }
  0xfc   : > { %313 = vrot.lane.b32.xlu2 %v265_v30, %s1154_s17 }
 0x101   : > { %v248_v31 = vpop.permute.xlu2 %247 }
 0x102   : > { %v268_v32 = vmin.f32 %v1267_v19, %v248_v31  ;;  %v276_v47 = vmax.f32 %v1267_v19, %v248_v31 }
 0x104   : > { %319 = vrot.lane.b32.xlu2 %v268_v32, %s1154_s17 }
 0x109   : > { %v254_v33 = vpop.permute.xlu2 %253 }
 0x10a   : > { %v271_v34 = vmin.f32 %v1281_v23, %v254_v33  ;;  %v279_v52 = vmax.f32 %v1281_v23, %v254_v33 }
 0x10c   : > { %325 = vrot.lane.b32.xlu2 %v271_v34, %s1154_s17 }
 0x110   : > { %v246_v35 = vpop.permute.xlu1 %245 }
 0x111   : > { %v267_v36 = vmin.f32 %v1255_v15, %v246_v35  ;;  %v288_v37 = vpop.permute.xlu2 %287  ;;  %v275_v54 = vmax.f32 %v1255_v15, %v246_v35 }
 0x112   : > { %v298_v38 = vmin.f32 %v1297_v27, %v288_v37  ;;  %v302_v56 = vmax.f32 %v1297_v27, %v288_v37 }
 0x113   : > { %317 = vrot.lane.b32.xlu1 %v267_v36, %s1154_s17 }
 0x114   : > { %359 = vrot.lane.b32.xlu2 %v298_v38, %s1154_s17 }
 0x118   : > { %v252_v39 = vpop.permute.xlu1 %251 }
 0x119   : > { %v270_v40 = vmin.f32 %v1265_v17, %v252_v39  ;;  %v244_v41 = vpop.permute.xlu0 %243  ;;  %v278_v58 = vmax.f32 %v1265_v17, %v252_v39 }
 0x11a   : > { %v266_v43 = vmin.f32 %v1272_v21, %v244_v41  ;;  %v274_v59 = vmax.f32 %v1272_v21, %v244_v41 }
 0x11b   : > { %323 = vrot.lane.b32.xlu1 %v270_v40, %s1154_s17 }
 0x11c   : > { %315 = vrot.lane.b32.xlu0 %v266_v43, %s1154_s17  ;;  %385 = vrot.lane.b32.xlu2 %v273_v42, %s1154_s17 }
 0x120   : > { %v286_v44 = vpop.permute.xlu1 %285 }
 0x121   : > { %v297_v45 = vmin.f32 %v1279_v22, %v286_v44  ;;  %v250_v46 = vpop.permute.xlu0 %249  ;;  %v301_v60 = vmax.f32 %v1279_v22, %v286_v44 }
 0x122   : > { %v269_v48 = vmin.f32 %v1285_v24, %v250_v46  ;;  %v277_v61 = vmax.f32 %v1285_v24, %v250_v46 }
 0x123   : > { %357 = vrot.lane.b32.xlu1 %v297_v45, %s1154_s17 }
 0x124   : > { %321 = vrot.lane.b32.xlu0 %v269_v48, %s1154_s17  ;;  %391 = vrot.lane.b32.xlu2 %v276_v47, %s1154_s17 }
 0x128   : > { %v292_v49 = vpop.permute.xlu1 %291 }
 0x129   : > { %v300_v50 = vmin.f32 %v1291_v25, %v292_v49  ;;  %v256_v51 = vpop.permute.xlu0 %255  ;;  %v304_v62 = vmax.f32 %v1291_v25, %v292_v49 }
 0x12a   : > { %v272_v53 = vmin.f32 %v1293_v26, %v256_v51  ;;  %v280_v63 = vmax.f32 %v1293_v26, %v256_v51 }
 0x12b   : > { %363 = vrot.lane.b32.xlu1 %v300_v50, %s1154_s17 }
 0x12c   : > { %327 = vrot.lane.b32.xlu0 %v272_v53, %s1154_s17  ;;  %397 = vrot.lane.b32.xlu2 %v279_v52, %s1154_s17 }
 0x131   : > { %v290_v55 = vpop.permute.xlu0 %289 }
 0x132   : > { %v299_v57 = vmin.f32 %v1303_v28, %v290_v55  ;;  %v303_v0 = vmax.f32 %v1303_v28, %v290_v55 }
 0x133   : > { %389 = vrot.lane.b32.xlu1 %v275_v54, %s1154_s17 }
 0x134   : > { %361 = vrot.lane.b32.xlu0 %v299_v57, %s1154_s17  ;;  %431 = vrot.lane.b32.xlu2 %v302_v56, %s1154_s17 }
 0x13b   : > { %395 = vrot.lane.b32.xlu1 %v278_v58, %s1154_s17 }
 0x13c   : > { %387 = vrot.lane.b32.xlu0 %v274_v59, %s1154_s17 }
 0x143   : > { %429 = vrot.lane.b32.xlu1 %v301_v60, %s1154_s17 }
 0x144   : > { %393 = vrot.lane.b32.xlu0 %v277_v61, %s1154_s17 }
 0x14b   : > { %435 = vrot.lane.b32.xlu1 %v304_v62, %s1154_s17 }
 0x14c   : > { %399 = vrot.lane.b32.xlu0 %v280_v63, %s1154_s17 }
 0x154   : > { %433 = vrot.lane.b32.xlu0 %v303_v0, %s1154_s17 }
 0x156   : > { %v314_v1 = vpop.permute.xlu2 %313 }
 0x157   : > { %v1356_v5 = vmax.f32 %v1260_v16, %v314_v1  ;;  %v1421_v63 = vmin.f32 %v1260_v16, %v314_v1 }
 0x15e   : > { %v320_v2 = vpop.permute.xlu2 %319 }
 0x15f   : > { %v348_v13 = vmax.f32 %v1267_v19, %v320_v2  ;;  %v1387_v35 = vmin.f32 %v1267_v19, %v320_v2 }
 0x161   : > { %v629_v0 = vrot.slane %v1387_v35, 2 }
 0x166   : > { %v326_v3 = vpop.permute.xlu2 %325 }
 0x167   : > { %v1365_v9 = vmax.f32 %v1281_v23, %v326_v3  ;;  %v1435_v16 = vmin.f32 %v1281_v23, %v326_v3  ;;  %v623_v23 = vrot.slane %v1421_v63, 2 }
 0x16e   : > { %v360_v4 = vpop.permute.xlu2 %359 }
 0x16f   : > { %v374_v14 = vmax.f32 %v1297_v27, %v360_v4  ;;  %v370_v32 = vmin.f32 %v1297_v27, %v360_v4  ;;  %v468_v27 = vrot.slane %v1387_v35, 1 }
 0x171   : > { %v470_v40 = vrot.slane %v370_v32, 1  ;;  %v631_v58 = vrot.slane %v370_v32, 2 }
 0x173   : > { %v471_v53 = vsel %vm461_vm3, %v468_v27, %v470_v40 }
 0x174   : > { %v493_v61 = vmax.f32 %v1387_v35, %v471_v53  ;;  %v462_v35 = vrot.slane %v1421_v63, 1 }
 0x176   : > { %v1358_v6 = vpop.permute.xlu2 %385 }
 0x177   : > { %v1362_v7 = vmax.f32 %v1356_v5, %v1358_v6 }
 0x17e   : > { %v392_v8 = vpop.permute.xlu2 %391 }
 0x17f   : > { %v1377_v18 = vmax.f32 %v348_v13, %v392_v8  ;;  %v1381_v29 = vmin.f32 %v348_v13, %v392_v8 }
 0x181   : > { %v516_v36 = vrot.slane %v1377_v18, 1  ;;  %v572_v39 = vrot.slane %v1381_v29, 1 }
 0x185   : > { %v1367_v10 = vpop.permute.xlu1 %317 }
 0x186   : > { %v1369_v11 = vpop.permute.xlu2 %397  ;;  %v339_v57 = vmin.f32 %v1255_v15, %v1367_v10 }
 0x187   : > { %v1373_v12 = vmax.f32 %v1365_v9, %v1369_v11  ;;  %v1449_v3 = vmin.f32 %v1365_v9, %v1369_v11 }
 0x188   : > { %v467_v4 = vrot.slane %v339_v57, 1 }
 0x189   : > { %v525_v9 = vrot.slane %v1373_v12, 1 }
 0x18d   : > { %v1379_v20 = vpop.permute.xlu1 %323 }
 0x18e   : > { %v1383_v30 = vpop.permute.xlu0 %315  ;;  %v432_v31 = vpop.permute.xlu2 %431  ;;  %v1462_v11 = vmin.f32 %v1265_v17, %v1379_v20 }
 0x18f   : > { %v442_v33 = vmin.f32 %v374_v14, %v432_v31  ;;  %v446_v34 = vmax.f32 %v374_v14, %v432_v31  ;;  %v1428_v8 = vmin.f32 %v1272_v21, %v1383_v30  ;;  %v632_v31 = vsel %vm622_vm4, %v629_v0, %v631_v58 }
 0x190   : > { %v654_v1 = vmax.f32 %v493_v61, %v632_v31  ;;  %v473_v31 = vrot.slane %v1462_v11, 1 }
 0x191   : > { %v518_v37 = vrot.slane %v446_v34, 1  ;;  %v574_v38 = vrot.slane %v442_v33, 1  ;;  %v463_v40 = vrot.slane %v1428_v8, 1 }
 0x193   : > { %v519_v41 = vsel %vm461_vm3, %v516_v36, %v518_v37  ;;  %v547_v42 = vmin.f32 %v446_v34, %v518_v37  ;;  %v575_v19 = vsel %vm461_vm3, %v572_v39, %v574_v38  ;;  %v603_v44 = vmin.f32 %v442_v33, %v574_v38 }
 0x194   : > { %v546_v43 = vmin.f32 %v1377_v18, %v519_v41  ;;  %v602_v45 = vmin.f32 %v1381_v29, %v575_v19  ;;  %v614_v46 = vmax.f32 %v1381_v29, %v575_v19  ;;  %v615_v47 = vmax.f32 %v442_v33, %v574_v38 }
 0x195   : > { %v727_v48 = vrot.slane %v547_v42, 1  ;;  %v1401_v49 = vpop.permute.xlu1 %357  ;;  %v679_v50 = vrot.slane %v603_v44, 1  ;;  %v1442_v37 = vmin.f32 %v1356_v5, %v1358_v6  ;;  %v469_v38 = vsel %vm461_vm3, %v467_v4, %v468_v27 }
 0x196   : > { %v1403_v51 = vrot.slane %v546_v43, 1  ;;  %v1405_v52 = vpop.permute.xlu0 %321  ;;  %v1408_v54 = vrot.slane %v602_v45, 1  ;;  %v1410_v55 = vrot.slane %v614_v46, 1  ;;  %v775_v56 = vrot.slane %v615_v47, 1 }
 0x197   : > { %v369_v43 = vmin.f32 %v1279_v22, %v1401_v49  ;;  %v477_v5 = vrot.slane %v1435_v16, 1  ;;  %v638_v6 = vrot.slane %v1435_v16, 2  ;;  %v628_v27 = vrot.slane %v339_v57, 2 }
 0x198   : > { %v680_v59 = vsel %vm461_vm3, %v1408_v54, %v679_v50  ;;  %v728_v60 = vsel %vm461_vm3, %v1403_v51, %v727_v48  ;;  %v776_v2 = vsel %vm461_vm3, %v1410_v55, %v775_v56  ;;  %v510_v44 = vrot.slane %v1362_v7, 1 }
 0x199   : > { %v702_v62 = vmax.f32 %v1381_v29, %v680_v59  ;;  %v750_v13 = vmin.f32 %v1377_v18, %v728_v60  ;;  %v566_v45 = vrot.slane %v1442_v37, 1  ;;  %v347_v46 = vmax.f32 %v1255_v15, %v1367_v10 }
 0x19a   : > { %v492_v47 = vmax.f32 %v339_v57, %v469_v38  ;;  %v464_v48 = vsel %vm461_vm3, %v462_v35, %v463_v40  ;;  %v1473_v50 = vmin.f32 %v1285_v24, %v1405_v52  ;;  %v581_v15 = vrot.slane %v1449_v3, 1 }
 0x19b   : > { %v798_v14 = vmin.f32 %v702_v62, %v776_v2  ;;  %v624_v10 = vrot.slane %v1428_v8, 2  ;;  %v465_v53 = vrot.slane %v369_v43, 1  ;;  %v630_v58 = vsel %vm622_vm4, %v628_v27, %v629_v0 }
 0x19c   : > { %v1486_v2 = vmax.f32 %v492_v47, %v630_v58  ;;  %v350_v4 = vmax.f32 %v1265_v17, %v1379_v20  ;;  %v472_v0 = vrot.slane %v1473_v50, 1  ;;  %v634_v35 = vrot.slane %v1462_v11, 2 }
 0x19d   : > { %v1432_v32 = vpop.permute.xlu1 %363  ;;  %v806_v33 = vmin.f32 %v798_v14, %v750_v13  ;;  %v814_v41 = vmax.f32 %v798_v14, %v750_v13  ;;  %v346_v13 = vmax.f32 %v1272_v21, %v1383_v30  ;;  %v490_v14 = vmax.f32 %v1421_v63, %v464_v48 }
 0x19e   : > { %v1437_v34 = vpop.permute.xlu0 %327  ;;  %v372_v59 = vmin.f32 %v1291_v25, %v1432_v32  ;;  %v625_v38 = vsel %vm622_vm4, %v623_v23, %v624_v10  ;;  %v626_v17 = vrot.slane %v369_v43, 2  ;;  %v349_v43 = vmax.f32 %v1285_v24, %v1405_v52 }
 0x19f   : > { %v822_v42 = vmax.f32 %v654_v1, %v806_v33  ;;  %v1479_v56 = vmin.f32 %v1293_v26, %v1437_v34  ;;  %v1505_v63 = vmax.f32 %v490_v14, %v625_v38  ;;  %v1515_v18 = vsel %vm461_vm3, %v472_v0, %v473_v31 }
 0x1a0   : > { %v480_v20 = vrot.slane %v372_v59, 1 }
 0x1a1   : > { %v830_v19 = vmin.f32 %v822_v42, %v814_v41  ;;  %v466_v41 = vsel %vm461_vm3, %v463_v40, %v465_v53  ;;  %v478_v42 = vrot.slane %v1479_v56, 1  ;;  %v373_v40 = vmax.f32 %v1279_v22, %v1401_v49 }
 0x1a2   : > { %v491_v23 = vmax.f32 %v1428_v8, %v466_v41  ;;  %v627_v53 = vsel %vm622_vm4, %v624_v10, %v626_v17  ;;  %v633_v22 = vrot.slane %v1473_v50, 2  ;;  %v641_v49 = vrot.slane %v372_v59, 2 }
 0x1a3   : > { %839 = vst.msk [vmem:[%s1467_s18 + $0x18] sm:$0xff] %vm835_vm5, %v830_v19  ;;  %v479_v29 = vsel %vm461_vm3, %v477_v5, %v478_v42  ;;  %v481_v8 = vsel %vm461_vm3, %v478_v42, %v480_v20  ;;  %v639_v24 = vrot.slane %v1479_v56, 2  ;;  %v494_v10 = vmax.f32 %v1473_v50, %v1515_v18 }
 0x1a4   : > { %v1528_v14 = vmax.f32 %v491_v23, %v627_v53  ;;  %v496_v59 = vmax.f32 %v1435_v16, %v479_v29  ;;  %v1545_v41 = vmax.f32 %v1293_v26, %v1437_v34 }
 0x1a5   : > { %v390_v57 = vpop.permute.xlu1 %389 }
 0x1a6   : > { %v411_v60 = vmin.f32 %v347_v46, %v390_v57  ;;  %v419_v61 = vmax.f32 %v347_v46, %v390_v57  ;;  %v1484_v62 = vpop.permute.xlu0 %361 }
 0x1a7   : > { %v1559_v26 = vmin.f32 %v1303_v28, %v1484_v62 }
 0x1a8   : > { %v515_v1 = vrot.slane %v419_v61, 1  ;;  %v571_v33 = vrot.slane %v411_v60, 1 }
 0x1aa   : > { %v517_v21 = vsel %vm461_vm3, %v515_v1, %v516_v36  ;;  %v573_v30 = vsel %vm461_vm3, %v571_v33, %v572_v39  ;;  %v497_v1 = vmax.f32 %v1479_v56, %v481_v8  ;;  %v640_v56 = vsel %vm622_vm4, %v638_v6, %v639_v24 }
 0x1ab   : > { %v545_v27 = vmin.f32 %v419_v61, %v517_v21  ;;  %v601_v19 = vmin.f32 %v411_v60, %v573_v30  ;;  %v613_v46 = vmax.f32 %v411_v60, %v573_v30 }
 0x1ad   : > { %v676_v36 = vrot.slane %v601_v19, 1  ;;  %v724_v39 = vrot.slane %v545_v27, 1  ;;  %v772_v47 = vrot.slane %v613_v46, 1  ;;  %v396_v48 = vpop.permute.xlu1 %395 }
 0x1ae   : > { %v388_v57 = vpop.permute.xlu0 %387  ;;  %v1561_v34 = vmax.f32 %v350_v4, %v396_v48 }
 0x1af   : > { %v678_v52 = vsel %vm461_vm3, %v676_v36, %v1408_v54  ;;  %v726_v5 = vsel %vm461_vm3, %v724_v39, %v1403_v51  ;;  %v1526_v58 = vmin.f32 %v346_v13, %v388_v57  ;;  %v774_v33 = vsel %vm461_vm3, %v772_v47, %v1410_v55 }
 0x1b0   : > { %v701_v0 = vmax.f32 %v411_v60, %v678_v52  ;;  %v1536_v38 = vmax.f32 %v346_v13, %v388_v57  ;;  %v1541_v51 = vmax.f32 %v1291_v25, %v1432_v32  ;;  %v749_v42 = vmin.f32 %v419_v61, %v726_v5 }
 0x1b1   : > { %v567_v54 = vrot.slane %v1526_v58, 1  ;;  %v642_v55 = vsel %vm622_vm4, %v639_v24, %v641_v49  ;;  %v1555_v25 = vmax.f32 %v496_v59, %v640_v56  ;;  %v1565_v61 = vmin.f32 %v350_v4, %v396_v48 }
 0x1b2   : > { %v797_v17 = vmin.f32 %v701_v0, %v774_v33  ;;  %v511_v60 = vrot.slane %v1536_v38, 1  ;;  %v1563_v16 = vmax.f32 %v497_v1, %v642_v55  ;;  %v521_v47 = vrot.slane %v1561_v34, 1 }
 0x1b3   : > { %v568_v13 = vsel %vm461_vm3, %v566_v45, %v567_v54 }
 0x1b4   : > { %v805_v32 = vmin.f32 %v797_v17, %v749_v42  ;;  %v813_v6 = vmax.f32 %v797_v17, %v749_v42  ;;  %v512_v20 = vsel %vm461_vm3, %v510_v44, %v511_v60  ;;  %v598_v27 = vmin.f32 %v1442_v37, %v568_v13 }
 0x1b5   : > { %v430_v21 = vpop.permute.xlu1 %429  ;;  %v542_v30 = vmin.f32 %v1362_v7, %v512_v20  ;;  %v610_v19 = vmax.f32 %v1442_v37, %v568_v13  ;;  %v1580_v44 = vmax.f32 %v1303_v28, %v1484_v62 }
 0x1b6   : > { %v821_v45 = vmax.f32 %v1486_v2, %v805_v32  ;;  %v394_v46 = vpop.permute.xlu0 %393  ;;  %v441_v23 = vmin.f32 %v373_v40, %v430_v21  ;;  %v445_v29 = vmax.f32 %v373_v40, %v430_v21  ;;  %v475_v2 = vrot.slane %v1559_v26, 1 }
 0x1b7   : > { %v1574_v36 = vmin.f32 %v349_v43, %v394_v46  ;;  %v1576_v4 = vmax.f32 %v349_v43, %v394_v46  ;;  %v577_v40 = vrot.slane %v1565_v61, 1  ;;  %v671_v43 = vrot.slane %v598_v27, 1 }
 0x1b8   : > { %v829_v39 = vmin.f32 %v821_v45, %v813_v6  ;;  %v513_v48 = vrot.slane %v445_v29, 1  ;;  %v569_v53 = vrot.slane %v441_v23, 1  ;;  %v719_v57 = vrot.slane %v542_v30, 1 }
 0x1b9   : > { %v520_v49 = vrot.slane %v1576_v4, 1  ;;  %v576_v8 = vrot.slane %v1574_v36, 1  ;;  %v767_v24 = vrot.slane %v610_v19, 1 }
 0x1ba   : > { %838 = vst.msk [vmem:[%s1467_s18 + $0x10] sm:$0xff] %vm835_vm5, %v829_v39  ;;  %v514_v28 = vsel %vm461_vm3, %v511_v60, %v513_v48  ;;  %v544_v62 = vmin.f32 %v445_v29, %v513_v48  ;;  %v570_v52 = vsel %vm461_vm3, %v567_v54, %v569_v53  ;;  %v600_v5 = vmin.f32 %v441_v23, %v569_v53 }
 0x1bb   : > { %v543_v59 = vmin.f32 %v1536_v38, %v514_v28  ;;  %v599_v0 = vmin.f32 %v1526_v58, %v570_v52  ;;  %v611_v1 = vmax.f32 %v1526_v58, %v570_v52  ;;  %v612_v33 = vmax.f32 %v441_v23, %v569_v53 }
 0x1bc   : > { %v674_v42 = vrot.slane %v600_v5, 1  ;;  %v722_v17 = vrot.slane %v544_v62, 1  ;;  %v522_v56 = vsel %vm461_vm3, %v520_v49, %v521_v47  ;;  %v578_v55 = vsel %vm461_vm3, %v576_v8, %v577_v40 }
 0x1bd   : > { %v436_v60 = vpop.permute.xlu1 %435  ;;  %v672_v54 = vrot.slane %v599_v0, 1  ;;  %v720_v13 = vrot.slane %v543_v59, 1  ;;  %v768_v32 = vrot.slane %v611_v1, 1  ;;  %v770_v6 = vrot.slane %v612_v33, 1 }
 0x1be   : > { %v400_v20 = vpop.permute.xlu0 %399  ;;  %v548_v21 = vmin.f32 %v1576_v4, %v522_v56  ;;  %v604_v45 = vmin.f32 %v1574_v36, %v578_v55  ;;  %v616_v30 = vmax.f32 %v1574_v36, %v578_v55  ;;  %v444_v27 = vmin.f32 %v1541_v51, %v436_v60 }
 0x1bf   : > { %v673_v19 = vsel %vm461_vm3, %v671_v43, %v672_v54  ;;  %v675_v46 = vsel %vm461_vm3, %v672_v54, %v674_v42  ;;  %v721_v23 = vsel %vm461_vm3, %v719_v57, %v720_v13  ;;  %v723_v29 = vsel %vm461_vm3, %v720_v13, %v722_v17 }
 0x1c0   : > { %v1611_v39 = vsel %vm461_vm3, %v473_v31, %v475_v2  ;;  %v699_v48 = vmax.f32 %v1442_v37, %v673_v19  ;;  %v700_v53 = vmax.f32 %v1526_v58, %v675_v46  ;;  %v747_v49 = vmin.f32 %v1362_v7, %v721_v23 }
 0x1c1   : > { %v748_v8 = vmin.f32 %v1536_v38, %v723_v29  ;;  %v769_v43 = vsel %vm461_vm3, %v767_v24, %v768_v32  ;;  %v771_v28 = vsel %vm461_vm3, %v768_v32, %v770_v6  ;;  %v1619_v57 = vrot.slane %v604_v45, 1 }
 0x1c2   : > { %v795_v62 = vmin.f32 %v699_v48, %v769_v43  ;;  %v796_v52 = vmin.f32 %v700_v53, %v771_v28  ;;  %v1621_v5 = vrot.slane %v548_v21, 1  ;;  %v448_v31 = vmax.f32 %v1541_v51, %v436_v60 }
 0x1c3   : > { %v1624_v2 = vrot.slane %v616_v30, 1  ;;  %v584_v37 = vrot.slane %v444_v27, 1  ;;  %v416_v58 = vmin.f32 %v1545_v41, %v400_v20  ;;  %v424_v7 = vmax.f32 %v1545_v41, %v400_v20 }
 0x1c4   : > { %v803_v38 = vmin.f32 %v795_v62, %v747_v49  ;;  %v804_v59 = vmin.f32 %v796_v52, %v748_v8  ;;  %v811_v24 = vmax.f32 %v795_v62, %v747_v49  ;;  %v812_v0 = vmax.f32 %v796_v52, %v748_v8 }
 0x1c5   : > { %v528_v1 = vrot.slane %v448_v31, 1  ;;  %v609_v33 = vmin.f32 %v444_v27, %v584_v37  ;;  %v621_v42 = vmax.f32 %v444_v27, %v584_v37  ;;  %v526_v17 = vrot.slane %v424_v7, 1 }
 0x1c6   : > { %v434_v56 = vpop.permute.xlu0 %433  ;;  %v819_v55 = vmax.f32 %v1505_v63, %v803_v38  ;;  %v820_v51 = vmax.f32 %v1528_v14, %v804_v59  ;;  %v582_v60 = vrot.slane %v416_v58, 1 }
 0x1c7   : > { %v1631_v54 = vmin.f32 %v1580_v44, %v434_v56  ;;  %v553_v13 = vmin.f32 %v448_v31, %v528_v1  ;;  %v689_v41 = vrot.slane %v609_v33, 1  ;;  %v785_v32 = vrot.slane %v621_v42, 1 }
 0x1c8   : > { %v527_v6 = vsel %vm461_vm3, %v525_v9, %v526_v17  ;;  %v827_v20 = vmin.f32 %v819_v55, %v811_v24  ;;  %v828_v21 = vmin.f32 %v820_v51, %v812_v0  ;;  %v529_v45 = vsel %vm461_vm3, %v526_v17, %v528_v1 }
 0x1c9   : > { %v551_v63 = vmin.f32 %v1373_v12, %v527_v6  ;;  %v737_v30 = vrot.slane %v553_v13, 1  ;;  %v552_v14 = vmin.f32 %v424_v7, %v529_v45  ;;  %v583_v27 = vsel %vm461_vm3, %v581_v15, %v582_v60 }
 0x1ca   : > { %v585_v19 = vsel %vm461_vm3, %v582_v60, %v584_v37  ;;  %836 = vst.msk [vmem:[%s1467_s18] sm:$0xff] %vm835_vm5, %v827_v20  ;;  %v607_v46 = vmin.f32 %v1449_v3, %v583_v27  ;;  %v619_v9 = vmax.f32 %v1449_v3, %v583_v27  ;;  %v447_v49 = vmax.f32 %v1580_v44, %v434_v56 }
 0x1cb   : > { %v608_v23 = vmin.f32 %v416_v58, %v585_v19  ;;  %v620_v29 = vmax.f32 %v416_v58, %v585_v19  ;;  %837 = vst.msk [vmem:[%s1467_s18 + $0x8] sm:$0xff] %vm835_vm5, %v828_v21  ;;  %v734_v48 = vrot.slane %v551_v63, 1  ;;  %v735_v53 = vrot.slane %v552_v14, 1 }
 0x1cc   : > { %v579_v8 = vrot.slane %v1631_v54, 1  ;;  %v686_v43 = vrot.slane %v607_v46, 1  ;;  %v782_v28 = vrot.slane %v619_v9, 1  ;;  %v523_v37 = vrot.slane %v447_v49, 1 }
 0x1cd   : > { %v687_v15 = vrot.slane %v608_v23, 1  ;;  %v783_v62 = vrot.slane %v620_v29, 1  ;;  %v736_v52 = vsel %vm461_vm3, %v734_v48, %v735_v53  ;;  %v738_v31 = vsel %vm461_vm3, %v735_v53, %v737_v30 }
 0x1ce   : > { %v580_v38 = vsel %vm461_vm3, %v577_v40, %v579_v8  ;;  %v753_v44 = vmin.f32 %v1373_v12, %v736_v52  ;;  %v754_v0 = vmin.f32 %v424_v7, %v738_v31  ;;  %v524_v56 = vsel %vm461_vm3, %v521_v47, %v523_v37 }
 0x1cf   : > { %v688_v59 = vsel %vm461_vm3, %v686_v43, %v687_v15  ;;  %v690_v24 = vsel %vm461_vm3, %v687_v15, %v689_v41  ;;  %v784_v42 = vsel %vm461_vm3, %v782_v28, %v783_v62  ;;  %v786_v17 = vsel %vm461_vm3, %v783_v62, %v785_v32 }
 0x1d0   : > { %v705_v1 = vmax.f32 %v1449_v3, %v688_v59  ;;  %v706_v33 = vmax.f32 %v416_v58, %v690_v24  ;;  %v550_v55 = vmin.f32 %v447_v49, %v523_v37  ;;  %v605_v40 = vmin.f32 %v1565_v61, %v580_v38 }
 0x1d1   : > { %v606_v51 = vmin.f32 %v1631_v54, %v579_v8  ;;  %v549_v12 = vmin.f32 %v1561_v34, %v524_v56  ;;  %v617_v3 = vmax.f32 %v1565_v61, %v580_v38  ;;  %v618_v58 = vmax.f32 %v1631_v54, %v579_v8 }
 0x1d2   : > { %v801_v60 = vmin.f32 %v705_v1, %v784_v42  ;;  %v802_v13 = vmin.f32 %v706_v33, %v786_v17  ;;  %v682_v7 = vrot.slane %v605_v40, 1  ;;  %v732_v32 = vrot.slane %v550_v55, 1 }
 0x1d3   : > { %v684_v41 = vrot.slane %v606_v51, 1  ;;  %v730_v30 = vrot.slane %v549_v12, 1  ;;  %v778_v14 = vrot.slane %v617_v3, 1  ;;  %v636_v23 = vrot.slane %v1559_v26, 2 }
 0x1d4   : > { %v809_v6 = vmin.f32 %v801_v60, %v753_v44  ;;  %v810_v20 = vmin.f32 %v802_v13, %v754_v0  ;;  %v817_v47 = vmax.f32 %v801_v60, %v753_v44  ;;  %v818_v21 = vmax.f32 %v802_v13, %v754_v0 }
 0x1d5   : > { %v683_v45 = vsel %vm461_vm3, %v1619_v57, %v682_v7  ;;  %v685_v63 = vsel %vm461_vm3, %v682_v7, %v684_v41  ;;  %v731_v9 = vsel %vm461_vm3, %v1621_v5, %v730_v30  ;;  %v733_v57 = vsel %vm461_vm3, %v730_v30, %v732_v32 }
 0x1d6   : > { %v825_v27 = vmax.f32 %v1555_v25, %v809_v6  ;;  %v826_v19 = vmax.f32 %v1563_v16, %v810_v20  ;;  %v703_v54 = vmax.f32 %v1574_v36, %v683_v45  ;;  %v704_v46 = vmax.f32 %v1565_v61, %v685_v63 }
 0x1d7   : > { %v780_v29 = vrot.slane %v618_v58, 1  ;;  %v495_v25 = vmax.f32 %v1462_v11, %v1611_v39  ;;  %v779_v36 = vsel %vm461_vm3, %v1624_v2, %v778_v14  ;;  %v751_v61 = vmin.f32 %v1576_v4, %v731_v9 }
 0x1d8   : > { %v833_v48 = vmin.f32 %v825_v27, %v817_v47  ;;  %v834_v16 = vmin.f32 %v826_v19, %v818_v21  ;;  %v799_v53 = vmin.f32 %v703_v54, %v779_v36  ;;  %v635_v39 = vsel %vm622_vm4, %v633_v22, %v634_v35 }
 0x1d9   : > { %v781_v26 = vsel %vm461_vm3, %v778_v14, %v780_v29  ;;  %v752_v5 = vmin.f32 %v1561_v34, %v733_v57  ;;  %v655_v4 = vmax.f32 %v494_v10, %v635_v39  ;;  %v637_v49 = vsel %vm622_vm4, %v634_v35, %v636_v23 }
 0x1da   : > { %842 = vst.msk [vmem:[%s1467_s18 + $0x30] sm:$0xff] %vm835_vm5, %v833_v48  ;;  %v800_v2 = vmin.f32 %v704_v46, %v781_v26  ;;  %v807_v8 = vmin.f32 %v799_v53, %v751_v61  ;;  %v656_v22 = vmax.f32 %v495_v25, %v637_v49  ;;  %v815_v34 = vmax.f32 %v799_v53, %v751_v61 }
 0x1db   : > { %843 = vst.msk [vmem:[%s1467_s18 + $0x38] sm:$0xff] %vm835_vm5, %v834_v16 }
 0x1dc   : > { %v808_v43 = vmin.f32 %v800_v2, %v752_v5  ;;  %v823_v15 = vmax.f32 %v655_v4, %v807_v8  ;;  %v816_v28 = vmax.f32 %v800_v2, %v752_v5 }
 0x1de   : > { %v824_v50 = vmax.f32 %v656_v22, %v808_v43  ;;  %v831_v18 = vmin.f32 %v823_v15, %v815_v34 }
 0x1e0   : > { %v832_v11 = vmin.f32 %v824_v50, %v816_v28  ;;  %840 = vst.msk [vmem:[%s1467_s18 + $0x20] sm:$0xff] %vm835_vm5, %v831_v18 }
 0x1e2   : > { %841 = vst.msk [vmem:[%s1467_s18 + $0x28] sm:$0xff] %vm835_vm5, %v832_v11 }
 0x1e3   : > { %1093 = shalt.err (!%p1090_p13)
}
 0x1e4   : > { %s1155_s5 = smov 128   ;;  %s1156_s13 = smov 8  }
 0x1e5   : > { %969 = dma.vmem_to_hbm [thread:$0]  (%p1218_p9), %s861_s25, 1024, %s863_s26, %s845_s27, %s1155_s5, %s1155_s5, %s1156_s13  }
 0x1e6 PF: > { %s877_s15 = sand.u32 1, %s1128_s6   ;;  %p976_p0 = pnand %p953_p12, %p1225_p11 }
 0x1e7   : > { %s878_s16 = scalar_lea.sflag [#allocation5], %s877_s15 }
 0x1e8   : > { %p977_p1 = pneg %p976_p0 }
 0x1ea   : > { %1123 = dma.done.wait (%p977_p1), %s878_s16, 1024  }
 0x1eb   : > { %1125 = vsyncadd (%p977_p1), %s878_s16, 4294966272  ;;  %s17_s11 = sadd.s32 1, %s1148_s11   ;;  %s1751_s6 = smov %s1132_s7 }
 0x1ec   : > { %p14_p2 = scmp.ge.s32.totalorder %s17_s11, 4   ;;  %s1752_s7 = smov %s1136_s8 }
 0x1ed   : > { %s1753_s8 = smov %s1223_s20  ;;  %s1754_s9 = smov %s1144_s10 }
 0x1ee   : > { %s1755_s10 = smov %s1757_s14  ;;  %16 = sbr.rel (!%p14_p2) target bundleno = 6 (0x6), region = 69 }
 0x1f3   :  { %884 = vsyncpa [#allocation4], 1 }
 0x1f4   :  { %886 = vsyncpa [#allocation4 + $0x1], 1 }
 0x1f5   :  { %887 = vsyncpa [#allocation5], 1 }
 0x1f6   :  { %889 = vsyncpa [#allocation5 + $0x1], 1 }

</bundles_post_ra>
